<compile_context>
chip_gen: v7x
topology: tpu7x:2x2x1
jax: 0.10.0
libtpu: 0.0.40
codegen_flags: <defaults>
</compile_context>

<pallas_src>
import functools

import jax
import jax.numpy as jnp
from jax.experimental import pallas as pl
from jax.experimental.pallas import tpu as pltpu


def _greedy_argmax_kernel(x_ref, o_ref, maxv_ref, maxi_ref, *, vocab_size):
    """One (row-tile, vocab-tile) grid step.

    x_ref   : (1, tT, tV) input tile (float)
    o_ref   : (1, tT)     int32 output tile (same block for every vocab step)
    maxv_ref: (1, tT)     running max    (VMEM scratch, compute dtype)
    maxi_ref: (1, tT)     running argmax (VMEM scratch, int32)
    """
    kv = pl.program_id(1)
    nkv = pl.num_programs(1)

    x = x_ref[...]
    if x.dtype != maxv_ref.dtype:
        # Upcast path (e.g. bf16 input on v5e, which has no bf16 VPU).
        x = x.astype(maxv_ref.dtype)
    t_v = x.shape[-1]

    def _reduce(vals):
        # Block-local argmax with first-occurrence tie-break.
        blk_max = jnp.max(vals, axis=-1)                              # (1, tT)
        local_col = jax.lax.broadcasted_iota(jnp.int32, vals.shape, 2)
        cand = jnp.where(vals == blk_max[..., None], local_col, t_v)
        return blk_max, jnp.min(cand, axis=-1)                        # (1, tT) i32

    v_rem = vocab_size % t_v
    if v_rem == 0:
        # No vocab padding anywhere: no mask work at all on the hot path.
        blk_max, blk_loc = _reduce(x)
    else:
        # Only the last vocab block is padded; only that block pays for the mask.
        neg_inf = jnp.array(-jnp.inf, dtype=x.dtype)

        def _reduce_masked():
            local_col = jax.lax.broadcasted_iota(jnp.int32, x.shape, 2)
            return _reduce(jnp.where(local_col < v_rem, x, neg_inf))

        blk_max, blk_loc = jax.lax.cond(kv == nkv - 1, _reduce_masked,
                                        lambda: _reduce(x))

    # Global vocab index: add the block offset to the reduced (1, tT) result
    # (one scalar-broadcast add instead of one add per input element).
    blk_idx = blk_loc + kv * t_v

    @pl.when(kv == 0)
    def _init():
        maxv_ref[...] = blk_max
        maxi_ref[...] = blk_idx

    @pl.when(kv > 0)
    def _accumulate():
        # Strict ">" keeps the earlier (smaller) index on ties, since vocab
        # blocks are visited in increasing order.
        better = blk_max > maxv_ref[...]
        maxv_ref[...] = jnp.where(better, blk_max, maxv_ref[...])
        maxi_ref[...] = jnp.where(better, blk_idx, maxi_ref[...])

    @pl.when(kv == nkv - 1)
    def _finalize():
        o_ref[...] = maxi_ref[...]


def _vmem_capacity_bytes():
    try:
        return int(pltpu.get_tpu_info().vmem_capacity_bytes)
    except Exception:
        return 64 * 1024 * 1024  # conservative (v7x-sized) fallback


def _select_compute_dtype(in_dtype):
    """bf16-native reductions on v6e/v7x; f32 otherwise."""
    in_dtype = jnp.dtype(in_dtype)
    if in_dtype == jnp.dtype(jnp.bfloat16):
        try:
            kind = jax.devices()[0].device_kind.lower()
        except Exception:
            kind = ""
        if ("v6" in kind) or ("v7" in kind):
            return jnp.bfloat16
    return jnp.float32


def _choose_tiles(rows, vocab, itemsize, block_budget_bytes):
    """Pick (tT, tV) so one input block fits the per-block budget.

    tT is a multiple of 128 when possible (lane-dense int32 output stores on the
    (1, tT) output block); tV is the full vocab (single pass) when it fits,
    otherwise the largest multiple of 128 that does.
    """
    if rows <= 128:
        tT = rows
    else:
        rows128 = -(-rows // 128) * 128
        tT = 128
        for cand in (1024, 512, 256, 128):
            if cand <= rows128:
                tT = cand
                break
        # Keep at least 2 row blocks so v7x's second TensorCore has work.
        while tT > 128 and -(-rows // tT) < 2:
            tT //= 2

    if tT * vocab * itemsize <= block_budget_bytes:
        tV = vocab
    else:
        tV = max(128, (block_budget_bytes // (tT * itemsize)) // 128 * 128)
    return tT, tV


def greedy_decode(batch_log_ctc_probs: jax.Array, *, tile_rows=None, tile_v=None) -> jax.Array:
    """argmax over the last axis, returned as int32 (Pallas TPU kernel)."""
    x = batch_log_ctc_probs
    *lead, V = x.shape
    rows = 1
    for d in lead:
        rows *= int(d)
    x2 = x.reshape(1, rows, V)

    itemsize = jnp.dtype(x.dtype).itemsize
    compute_dtype = _select_compute_dtype(x.dtype)

    # Generation-aware budgets: v7x has only 64 MiB VMEM, v5e/v6e have 128 MiB.
    vmem_cap = _vmem_capacity_bytes()
    vmem_limit = min(vmem_cap // 2, 64 * 1024 * 1024)
    block_budget = min(vmem_limit // 4, 16 * 1024 * 1024)  # double-buffered input fits easily

    tT, tV = _choose_tiles(rows, V, itemsize, block_budget)
    if tile_rows is not None:
        tT = tile_rows
    if tile_v is not None:
        tV = tile_v

    grid = (pl.cdiv(rows, tT), pl.cdiv(V, tV))
    kernel = functools.partial(_greedy_argmax_kernel, vocab_size=V)

    out = pl.pallas_call(
        kernel,
        out_shape=jax.ShapeDtypeStruct((1, rows), jnp.int32),
        grid=grid,
        in_specs=[pl.BlockSpec((1, tT, tV), lambda r, kv: (0, r, kv))],
        # Same output block for every vocab step -> VMEM-resident across the sweep.
        out_specs=pl.BlockSpec((1, tT), lambda r, kv: (0, r)),
        scratch_shapes=[
            pltpu.VMEM((1, tT), compute_dtype),  # running max
            pltpu.VMEM((1, tT), jnp.int32),      # running argmax
        ],
        compiler_params=pltpu.CompilerParams(
            dimension_semantics=("parallel", "arbitrary"),
            vmem_limit_bytes=vmem_limit,
        ),
    )(x2)
    return out.reshape(tuple(lead))


if __name__ == "__main__":
    # GreedyDecoder has no parameters; only synthetic inputs are needed.
    key = jax.random.PRNGKey(0)

    # 1) Small shape consistent with the module: (batch, time, vocab).
    B, T, V = 2, 8, 32
    logits = jax.random.normal(key, (B, T, V), dtype=jnp.float32)
    log_probs = jax.nn.log_softmax(logits, axis=-1)  # mimic "log CTC probs"
    out = jax.block_until_ready(greedy_decode(log_probs))
    ref = jnp.argmax(log_probs, axis=-1).astype(jnp.int32)
    assert out.shape == (B, T) and out.dtype == jnp.int32
    assert bool(jnp.all(out == ref))

    # 2) Tiled path with padding on both the row axis (B*T=74, tile 32) and the
    #    vocab axis (V=200, tile 128) -> exercises the masked last vocab block,
    #    the cross-block accumulator and row-writeback masking.
    B2, T2, V2 = 2, 37, 200
    lp2 = jax.nn.log_softmax(
        jax.random.normal(jax.random.PRNGKey(1), (B2, T2, V2), dtype=jnp.float32), axis=-1)
    out2 = jax.block_until_ready(greedy_decode(lp2, tile_rows=32, tile_v=128))
    ref2 = jnp.argmax(lp2, axis=-1).astype(jnp.int32)
    assert out2.shape == (B2, T2) and out2.dtype == jnp.int32
    assert bool(jnp.all(out2 == ref2))

    # 3) Default (auto-tiled) path with rows >= 128, single vocab pass, bf16 input.
    B3, T3, V3 = 2, 150, 384
    lp3 = jax.nn.log_softmax(
        jax.random.normal(jax.random.PRNGKey(2), (B3, T3, V3), dtype=jnp.float32),
        axis=-1).astype(jnp.bfloat16)
    out3 = jax.block_until_ready(greedy_decode(lp3))
    ref3 = jnp.argmax(lp3, axis=-1).astype(jnp.int32)
    assert out3.shape == (B3, T3) and out3.dtype == jnp.int32
    assert bool(jnp.all(out3 == ref3))

    print("KERNEL_OK")
</pallas_src>

<mosaic_0001>
module attributes {stable_mosaic.version = 11 : i64} {
  func.func @_greedy_argmax_kernel(%arg0: i32, %arg1: i32, %arg2: memref<1x16x32xf32, #tpu.memory_space<vmem>>, %arg3: memref<1x16xi32, #tpu.memory_space<vmem>>, %arg4: memref<1x16xf32, #tpu.memory_space<vmem>>, %arg5: memref<1x16xi32, #tpu.memory_space<vmem>>) attributes {dimension_semantics = [#tpu.dimension_semantics<parallel>, #tpu.dimension_semantics<arbitrary>], iteration_bounds = array<i64: 1, 1>, scalar_prefetch = 0 : i64, scratch_operands = 2 : i64, tpu.core_type = #tpu.core_type<tc>, window_params = [{transform_indices = @transform_0, window_bounds = array<i64: 1, 16, 32>}, {transform_indices = @transform_1, window_bounds = array<i64: 1, 16>}]} {
    %c0 = arith.constant 0 : index
    %c0_0 = arith.constant 0 : index
    %c0_1 = arith.constant 0 : index
    %0 = vector.load %arg2[%c0, %c0_0, %c0_1] : memref<1x16x32xf32, #tpu.memory_space<vmem>>, vector<1x16x32xf32>
    %cst = arith.constant dense<0xFF800000> : vector<1x16xf32>
    %1 = vector.multi_reduction <maximumf>, %0, %cst [2] : vector<1x16x32xf32> to vector<1x16xf32>
    %2 = tpu.iota {dimensions = array<i32: 2>} : vector<1x16x32xi32>
    %3 = vector.shape_cast %1 : vector<1x16xf32> to vector<1x16x1xf32>
    %4 = vector.broadcast %3 : vector<1x16x1xf32> to vector<1x16x32xf32>
    %5 = arith.cmpf oeq, %0, %4 : vector<1x16x32xf32>
    %c32_i32 = arith.constant 32 : i32
    %6 = vector.broadcast %c32_i32 : i32 to vector<1x16x32xi32>
    %7 = arith.select %5, %2, %6 : vector<1x16x32xi1>, vector<1x16x32xi32>
    %cst_2 = arith.constant dense<2147483647> : vector<1x16xi32>
    %8 = vector.multi_reduction <minsi>, %7, %cst_2 [2] : vector<1x16x32xi32> to vector<1x16xi32>
    %c32_i32_3 = arith.constant 32 : i32
    %9 = arith.muli %arg1, %c32_i32_3 : i32
    %10 = vector.broadcast %9 : i32 to vector<1x16xi32>
    %11 = arith.addi %8, %10 : vector<1x16xi32>
    %c0_i32 = arith.constant 0 : i32
    %12 = arith.cmpi eq, %arg1, %c0_i32 : i32
    %13 = arith.extui %12 : i1 to i32
    %c0_i32_4 = arith.constant 0 : i32
    %14 = arith.cmpi ne, %13, %c0_i32_4 : i32
    scf.if %14 {
      %c0_9 = arith.constant 0 : index
      %c0_10 = arith.constant 0 : index
      %21 = vector.load %arg4[%c0_9, %c0_10] : memref<1x16xf32, #tpu.memory_space<vmem>>, vector<1x16xf32>
      tpu.vector_store %arg4[%c0_9, %c0_10], %1 {strides = array<i32>} : memref<1x16xf32, #tpu.memory_space<vmem>>, vector<1x16xf32>,
      %c0_11 = arith.constant 0 : index
      %c0_12 = arith.constant 0 : index
      %22 = vector.load %arg5[%c0_11, %c0_12] : memref<1x16xi32, #tpu.memory_space<vmem>>, vector<1x16xi32>
      tpu.vector_store %arg5[%c0_11, %c0_12], %11 {strides = array<i32>} : memref<1x16xi32, #tpu.memory_space<vmem>>, vector<1x16xi32>,
    } else {
    }
    %c0_i32_5 = arith.constant 0 : i32
    %15 = arith.cmpi sgt, %arg1, %c0_i32_5 : i32
    %16 = arith.extui %15 : i1 to i32
    %c0_i32_6 = arith.constant 0 : i32
    %17 = arith.cmpi ne, %16, %c0_i32_6 : i32
    scf.if %17 {
      %c0_9 = arith.constant 0 : index
      %c0_10 = arith.constant 0 : index
      %21 = vector.load %arg4[%c0_9, %c0_10] : memref<1x16xf32, #tpu.memory_space<vmem>>, vector<1x16xf32>
      %22 = arith.cmpf ogt, %1, %21 : vector<1x16xf32>
      %c0_11 = arith.constant 0 : index
      %c0_12 = arith.constant 0 : index
      %23 = vector.load %arg4[%c0_11, %c0_12] : memref<1x16xf32, #tpu.memory_space<vmem>>, vector<1x16xf32>
      %24 = arith.select %22, %1, %23 : vector<1x16xi1>, vector<1x16xf32>
      %c0_13 = arith.constant 0 : index
      %c0_14 = arith.constant 0 : index
      %25 = vector.load %arg4[%c0_13, %c0_14] : memref<1x16xf32, #tpu.memory_space<vmem>>, vector<1x16xf32>
      tpu.vector_store %arg4[%c0_13, %c0_14], %24 {strides = array<i32>} : memref<1x16xf32, #tpu.memory_space<vmem>>, vector<1x16xf32>,
      %c0_15 = arith.constant 0 : index
      %c0_16 = arith.constant 0 : index
      %26 = vector.load %arg5[%c0_15, %c0_16] : memref<1x16xi32, #tpu.memory_space<vmem>>, vector<1x16xi32>
      %27 = arith.select %22, %11, %26 : vector<1x16xi1>, vector<1x16xi32>
      %c0_17 = arith.constant 0 : index
      %c0_18 = arith.constant 0 : index
      %28 = vector.load %arg5[%c0_17, %c0_18] : memref<1x16xi32, #tpu.memory_space<vmem>>, vector<1x16xi32>
      tpu.vector_store %arg5[%c0_17, %c0_18], %27 {strides = array<i32>} : memref<1x16xi32, #tpu.memory_space<vmem>>, vector<1x16xi32>,
    } else {
    }
    %c0_i32_7 = arith.constant 0 : i32
    %18 = arith.cmpi eq, %arg1, %c0_i32_7 : i32
    %19 = arith.extui %18 : i1 to i32
    %c0_i32_8 = arith.constant 0 : i32
    %20 = arith.cmpi ne, %19, %c0_i32_8 : i32
    scf.if %20 {
      %c0_9 = arith.constant 0 : index
      %c0_10 = arith.constant 0 : index
      %21 = vector.load %arg5[%c0_9, %c0_10] : memref<1x16xi32, #tpu.memory_space<vmem>>, vector<1x16xi32>
      %c0_11 = arith.constant 0 : index
      %c0_12 = arith.constant 0 : index
      %22 = vector.load %arg3[%c0_11, %c0_12] : memref<1x16xi32, #tpu.memory_space<vmem>>, vector<1x16xi32>
      tpu.vector_store %arg3[%c0_11, %c0_12], %21 {strides = array<i32>} : memref<1x16xi32, #tpu.memory_space<vmem>>, vector<1x16xi32>,
    } else {
    }
    return
  }
  func.func @transform_0(%arg0: i32, %arg1: i32) -> (i32, i32, i32) {
    %c0_i32 = arith.constant 0 : i32
    %c0_i32_0 = arith.constant 0 : i32
    return %c0_i32, %arg0, %arg1 : i32, i32, i32
  }
  func.func @transform_1(%arg0: i32, %arg1: i32) -> (i32, i32) {
    %c0_i32 = arith.constant 0 : i32
    %c0_i32_0 = arith.constant 0 : i32
    return %c0_i32, %arg0 : i32, i32
  }
}

</mosaic_0001>

<bundles_post_ra>
// kernel: tpu_custom_call.1
= control target key start
LH: loop header
LB: loop body
LE: loop exit
PB: predicated region body
PF: predicated region fallthrough
CT: control target
= control target key end

     0   :  { %6 = vsyncpa [#allocation5], 0  ;;  %s297_s0 = inlined_call_operand.hbm [shape: f32[1,16,32], index: 0, kind: input, shape index: {}]   ;;  %s298_s1 = inlined_call_operand.hbm [shape: s32[1,16], index: 1, kind: output, shape index: {}]  }
   0x1   :  { %7 = vsyncpa [#allocation6], 0  ;;  %s252_s6 = smov [#allocation4]   ;;  %s204_s10 = scalar_lea.hbm %s297_s0, 256 }
   0x2   :  { %s13_s7 = sshll.u32 %s252_s6, 4  ;;  %p205_p0 = scmp.ne.s32.totalorder %s297_s0, %s204_s10  ;;  %s14_s7 = int_to_ptr.vmem [resolvable:$true] %s13_s7 }
   0x3   :  { %p208_p1 = scmp.lt.u32.totalorder %s204_s10, %s297_s0 }
   0x5   :  { %p210_p2 = pnand %p208_p1, %p205_p0 }
   0x7   :  { %213 = shalt.err (!%p210_p2)
}
   0x8   :  { %s214_s15 = scalar_lea.vmem %s14_s7, 256  ;;  %p219_p4 = scmp.lt.s32.totalorder %s14_s7, %s14_s7 }
   0x9   :  { %p215_p3 = scmp.ne.s32.totalorder %s14_s7, %s214_s15  ;;  %p220_p5 = scmp.lt.s32.totalorder %s214_s15, %s214_s15 }
   0xb   :  { %p221_p6 = por %p220_p5, %p219_p4 }
   0xd   :  { %p222_p7 = pnand %p221_p6, %p215_p3 }
   0xf   :  { %225 = shalt.err (!%p222_p7)
}
  0x10   :  { %s253_s16 = smov 128   ;;  %s254_s17 = smov 8  }
  0x11   :  { %19 = dma.hbm_to_vmem [thread:$0]  %s297_s0, 256, %s14_s7, [#allocation5], %s253_s16, %s253_s16, %s254_s17  }
  0x12   :  { %248 = dma.done.wait [#allocation5], 256  }
  0x13   :  { %249 = vsyncadd [#allocation5], 4294967040  ;;  %vm25_vm0 = vcmask 261120   ;;  %v23_v0 = vld [vmem:[#allocation4] sm:$0xff]  ;;  %v24_v1 = vld [vmem:[#allocation4 + $0x8] sm:$0xff]  ;;  %v32_v4 = vlaneseq  ;;  %vm87_vm2 = vcmask 130112  }
  0x14   :  { %v26_v2 = vsel %vm25_vm0, %v23_v0, -inf  ;;  %v29_v3 = vsel %vm25_vm0, %v24_v1, -inf  ;;  %vm90_vm4 = vcmask 122880   ;;  %s255_s0 = smov [#allocation7]  }
  0x15   :  { %27 = vmax.xlane.f32.xlu0 %v26_v2  ;;  %v33_v5 = vand.u32 127, %v32_v4  ;;  %v79_v6 = vshrl.u32 %v32_v4, 7  ;;  %s189_s20 = sshll.u32 %s255_s0, 4  ;;  %s190_s20 = int_to_ptr.vmem [resolvable:$true] %s189_s20 }
  0x16   :  { %s226_s21 = scalar_lea.vmem %s190_s20, 16  ;;  %s230_s22 = scalar_lea.vmem %s190_s20, 32 }
  0x17   :  { %v82_v7 = vadd.s32 4294967288, %v33_v5  ;;  %v80_v9 = vsub.s32 %v33_v5, %v79_v6  ;;  %p227_p8 = scmp.ne.s32.totalorder %s190_s20, %s226_s21  ;;  %p231_p9 = scmp.lt.s32.totalorder %s190_s20, %s190_s20 }
  0x18   :  { %p232_p10 = scmp.lt.s32.totalorder %s230_s22, %s226_s21 }
  0x19   :  { %30 = vmax.xlane.f32.xlu0 %v29_v3  ;;  %v85_v10 = vsub.s32 %v82_v7, %v79_v6 }
  0x1a   :  { %p233_p11 = por %p232_p10, %p231_p9 }
  0x1c   :  { %p234_p12 = pnand %p233_p11, %p227_p8 }
  0xa2   :  { %v28_v8 = vpop.xlane.xlu0 %27 }
  0xa3   :  { %vm34_vm1 = vcmp.eq.f32.partialorder %v23_v0, %v28_v8 }
  0xa4   :  { %v36_v11 = vsel %vm34_vm1, %v33_v5, 32 }
  0xa5   :  { %v38_v12 = vsel %vm25_vm0, %v36_v11, 2147483647 }
  0xa6   :  { %v31_v13 = vpop.xlane.xlu0 %30  ;;  %v40_v14 = vshra.s32 %v38_v12, 16  ;;  %v39_v20 = vand.u32 65535, %v38_v12 }
  0xa7   :  { %vm35_vm3 = vcmp.eq.f32.partialorder %v24_v1, %v31_v13 }
  0xa8   :  { %v37_v15 = vsel %vm35_vm3, %v33_v5, 32  ;;  %v42_v16 = vcvt.s32.f32 %v40_v14  ;;  %v41_v22 = vcvt.s32.f32 %v39_v20 }
  0xa9   :  { %v53_v17 = vsel %vm25_vm0, %v37_v15, 2147483647 }
  0xaa   :  { %43 = vmin.xlane.f32.xlu1 %v42_v16  ;;  %v55_v18 = vshra.s32 %v53_v17, 16  ;;  %v54_v23 = vand.u32 65535, %v53_v17 }
  0xac   :  { %v57_v19 = vcvt.s32.f32 %v55_v18  ;;  %v56_v26 = vcvt.s32.f32 %v54_v23 }
  0xae   :  { %58 = vmin.xlane.f32.xlu1 %v57_v19 }
 0x137   :  { %v44_v21 = vpop.xlane.xlu1 %43 }
 0x138   :  { %vm45_vm5 = vcmp.eq.f32.partialorder %v42_v16, %v44_v21  ;;  %v50_v28 = vcvt.f32.s32 %v44_v21 }
 0x139   :  { %v46_v24 = vsel %vm45_vm5, %v41_v22, inf }
 0x13a   :  { %47 = vmin.xlane.f32.xlu0 %v46_v24  ;;  %v51_v32 = vshll.u32 %v50_v28, 16 }
 0x13b   :  { %v59_v25 = vpop.xlane.xlu1 %58 }
 0x13c   :  { %vm60_vm6 = vcmp.eq.f32.partialorder %v57_v19, %v59_v25  ;;  %v65_v30 = vcvt.f32.s32 %v59_v25 }
 0x13d   :  { %v61_v27 = vsel %vm60_vm6, %v56_v26, inf }
 0x13e   :  { %62 = vmin.xlane.f32.xlu1 %v61_v27  ;;  %v66_v34 = vshll.u32 %v65_v30, 16 }
 0x1c7   :  { %v48_v29 = vpop.xlane.xlu0 %47 }
 0x1c8   :  { %v49_v31 = vcvt.f32.s32 %v48_v29 }
 0x1ca   :  { %v52_v35 = vadd.s32 %v51_v32, %v49_v31 }
 0x1cb   :  { %v63_v33 = vpop.xlane.xlu1 %62 }
 0x1cc   :  { %v64_v36 = vcvt.f32.s32 %v63_v33  ;;  %v95_v38 = vrot.slane %v52_v35, %v80_v9 }
 0x1ce   :  { %v67_v37 = vadd.s32 %v66_v34, %v64_v36 }
 0x1d0   :  { %v99_v39 = vrot.slane %v67_v37, %v85_v10 }
 0x1d2   :  { %v100_v40 = vsel %vm87_vm2, %v99_v39, %v95_v38 }
 0x1d3   :  { %101 = vst.msk [vmem:[#allocation3] sm:$0x1] %vm90_vm4, %v100_v40 }
 0x1da   :  { %v180_v41 = vld [vmem:[#allocation3] sm:$0x1] }
 0x1db   :  { %182 = vst.msk [vmem:[#allocation7] sm:$0x1] %vm90_vm4, %v180_v41 }
 0x1dc   :  { %237 = shalt.err (!%p234_p12)
}
 0x1dd   :  { %s238_s25 = scalar_lea.hbm %s298_s1, 16 }
 0x1de   :  { %p239_p13 = scmp.ne.s32.totalorder %s298_s1, %s238_s25  ;;  %p242_p0 = scmp.lt.u32.totalorder %s238_s25, %s298_s1 }
 0x1e0   :  { %p244_p1 = pnand %p242_p0, %p239_p13 }
 0x1e2   :  { %247 = shalt.err (!%p244_p1)
}
 0x1e3   :  { %192 = dma.vmem_to_hbm [thread:$0]  %s190_s20, 16, %s298_s1, [#allocation6]  }
 0x1e4   :  { %250 = dma.done.wait [#allocation6], 16  }
 0x1e5   :  { %251 = vsyncadd [#allocation6], 4294967280 }
 0x1e6   :  { %196 = vsyncpa [#allocation5], 1 }
 0x1e7   :  { %197 = vsyncpa [#allocation6], 1 }

</bundles_post_ra>
